<compile_context>
chip_gen: v7x
topology: tpu7x:2x2x1
jax: 0.10.0
libtpu: 0.0.40
codegen_flags: <defaults>
</compile_context>

<pallas_src>
import jax
import jax.numpy as jnp
from jax.experimental import pallas as pl
from jax.experimental.pallas import tpu as pltpu


def _round_up(x, m):
    return (x + m - 1) // m * m


def _make_gcn_agg_kernel(tk_eff, xw_resident):
    """One (tm, tn) output tile; reduction over neighbor tiles on grid axis 2.

    The f32 output tile itself is the accumulator (its block index is constant
    across the k axis), so no VMEM scratch is needed.
    """

    def kernel(adj_ref, xw_ref, b_ref, o_ref):
        k = pl.program_id(2)

        if xw_resident:
            # XW covers the full reduction dim in VMEM; slice current k chunk.
            start = pl.multiple_of(k * tk_eff, tk_eff)
            xw_blk = xw_ref[pl.ds(start, tk_eff), :]
        else:
            xw_blk = xw_ref[...]

        part = jnp.dot(adj_ref[...], xw_blk,
                       preferred_element_type=jnp.float32)

        @pl.when(k == 0)
        def _():
            o_ref[...] = part

        @pl.when(k > 0)
        def _():
            o_ref[...] += part

        @pl.when(k == pl.num_programs(2) - 1)
        def _():
            # f32 epilogue in place: bias + LeakyReLU(0.1)
            y = o_ref[...] + b_ref[...]
            o_ref[...] = jnp.where(y > 0, y, 0.1 * y)

    return kernel


def build_normalized_adj(edge_index, num_nodes, *, pad_rows=None,
                         pad_cols=None, dtype=jnp.float32):
    """Dense A_hat = D^{-1/2}(A+I)D^{-1/2}, GCNConv-style (add self loops).

    Emitted directly at the padded shape and target dtype: one scatter pass,
    no separate pad / cast sweeps over the N x N array.
    """
    pr = num_nodes if pad_rows is None else pad_rows
    pc = num_nodes if pad_cols is None else pad_cols
    row, col = edge_index[0], edge_index[1]
    loop = jnp.arange(num_nodes, dtype=edge_index.dtype)
    row = jnp.concatenate([row, loop])
    col = jnp.concatenate([col, loop])
    ew = jnp.ones(row.shape[0], dtype=jnp.float32)
    deg = jnp.zeros(num_nodes, jnp.float32).at[col].add(ew)
    dinv = jnp.where(deg > 0, jax.lax.rsqrt(deg), 0.0)
    norm = dinv[row] * ew * dinv[col]
    # message j -> i aggregates x[j] into out[i]: adj[i, j] = norm(edge j->i)
    adj = jnp.zeros((pr, pc), jnp.float32).at[col, row].add(norm)
    return adj.astype(dtype)


def conv_block_pallas(x, edge_index, w, b, *, tm=512, tn=256, tk=512,
                      use_bf16=True, small_fastpath_bytes=8 << 20,
                      xw_resident_budget=24 << 20):
    """GCNConv + LeakyReLU(0.1).

    x: [N, Cin], edge_index: [2, E] int, w: [Cin, Cout], b: [1, Cout].
    Returns [N, Cout] float32.
    """
    n = x.shape[0]
    c_out = w.shape[1]
    mm_dtype = jnp.bfloat16 if use_bf16 else jnp.float32
    itemsize = jnp.dtype(mm_dtype).itemsize

    # ---- feature transform once (tiny K): plain XLA matmul --------------
    xw = jnp.dot(x.astype(jnp.float32), w.astype(jnp.float32))  # [N, Cout]

    # ---- minimum (8,128)-aligned padded dims -----------------------------
    n_rows_min = _round_up(n, 8)
    n_cols_min = _round_up(n, 128)
    c_pad_min = _round_up(c_out, 128)

    small_bytes = (n_rows_min * n_cols_min * itemsize        # adj
                   + n_cols_min * c_pad_min * itemsize       # xw
                   + n_rows_min * c_pad_min * 4              # out
                   + c_pad_min * 4)                          # bias

    if small_bytes <= small_fastpath_bytes:
        # Small-problem fast path: whole-array blocks, single grid step.
        tm_eff, tk_eff, tn_eff = n_rows_min, n_cols_min, c_pad_min
        n_rows, n_cols, c_pad = n_rows_min, n_cols_min, c_pad_min
    else:
        tn_eff = max(128, min(_round_up(tn, 128), c_pad_min))   # lane dim
        c_pad = _round_up(c_out, tn_eff)
        tk_eff = max(128, min(_round_up(tk, 128), n_cols_min))  # adj lane dim
        n_cols = _round_up(n, tk_eff)
        tm_eff = max(8, min(_round_up(tm, 8), n_rows_min))       # sublane dim
        # v7x has 2 TensorCores: keep >=2 blocks on the "parallel" row axis
        # for mid/large graphs so the second core does not idle.
        if _round_up(n, tm_eff) // tm_eff < 2 and n >= 1024:
            tm_eff = max(256, _round_up(n_rows_min // 2, 8))
        n_rows = _round_up(n, tm_eff)

    # Keep the whole padded XW column-panel resident in VMEM across i and k
    # (re-fetched only when the output-column block j changes) when it fits.
    xw_bytes_resident = 2 * n_cols * tn_eff * itemsize  # double-buffered
    xw_resident = xw_bytes_resident <= xw_resident_budget

    # ---- operands: padded, already in matmul dtype -----------------------
    adj_p = build_normalized_adj(edge_index, n, pad_rows=n_rows,
                                 pad_cols=n_cols, dtype=mm_dtype)
    xw_p = jnp.pad(xw, ((0, n_cols - n), (0, c_pad - c_out))).astype(mm_dtype)
    b_p = jnp.pad(b.astype(jnp.float32).reshape(1, c_out),
                  ((0, 0), (0, c_pad - c_out)))

    grid = (n_rows // tm_eff, c_pad // tn_eff, n_cols // tk_eff)

    if xw_resident:
        xw_spec = pl.BlockSpec((n_cols, tn_eff), lambda i, j, k: (0, j))
    else:
        xw_spec = pl.BlockSpec((tk_eff, tn_eff), lambda i, j, k: (k, j))

    # ---- explicit VMEM budget (fits v7x's 64 MiB with headroom) ----------
    vmem_need = (2 * tm_eff * tk_eff * itemsize                  # adj tile
                 + (xw_bytes_resident if xw_resident
                    else 2 * tk_eff * tn_eff * itemsize)         # xw
                 + 2 * tm_eff * tn_eff * 4                       # out tile
                 + 2 * tn_eff * 4)                               # bias
    vmem_limit = int(min(max(vmem_need + (2 << 20), 32 << 20), 48 << 20))

    xw_hbm_bytes = (1 if xw_resident else grid[0]) * n_cols * c_pad * itemsize
    cost = pl.CostEstimate(
        flops=2 * n_rows * n_cols * c_pad,
        transcendentals=0,
        bytes_accessed=(n_rows * n_cols * itemsize      # adj (dominant stream)
                        + xw_hbm_bytes                  # xw
                        + n_rows * c_pad * 4            # out
                        + c_pad * 4))                   # bias

    out = pl.pallas_call(
        _make_gcn_agg_kernel(tk_eff, xw_resident),
        out_shape=jax.ShapeDtypeStruct((n_rows, c_pad), jnp.float32),
        grid_spec=pltpu.PrefetchScalarGridSpec(
            num_scalar_prefetch=0,
            grid=grid,
            in_specs=[
                pl.BlockSpec((tm_eff, tk_eff), lambda i, j, k: (i, k)),
                xw_spec,
                pl.BlockSpec((1, tn_eff), lambda i, j, k: (0, j)),
            ],
            out_specs=pl.BlockSpec((tm_eff, tn_eff), lambda i, j, k: (i, j)),
        ),
        compiler_params=pltpu.CompilerParams(
            dimension_semantics=("parallel", "parallel", "arbitrary"),
            vmem_limit_bytes=vmem_limit),
        cost_estimate=cost,
    )(adj_p, xw_p, b_p)

    return out[:n, :c_out]


def conv_block_ref(adj_norm, x, w, b):
    y = adj_norm @ (x @ w) + b
    return jnp.where(y > 0, y, 0.1 * y)


def _make_case(key, num_nodes, in_channels, out_channels, num_edges):
    k_x, k_w, k_b, k_e = jax.random.split(key, 4)
    x = jax.random.normal(k_x, (num_nodes, in_channels), jnp.float32)
    limit = (6.0 / (in_channels + out_channels)) ** 0.5
    w = jax.random.uniform(k_w, (in_channels, out_channels), jnp.float32,
                           -limit, limit)
    b = jax.random.uniform(k_b, (1, out_channels), jnp.float32, -0.1, 0.1)
    edge_index = jax.random.randint(k_e, (2, num_edges), 0, num_nodes,
                                    dtype=jnp.int32)
    return x, edge_index, w, b


if __name__ == "__main__":
    key = jax.random.PRNGKey(0)
    k0, k1 = jax.random.split(key, 2)

    # Case 1: the module's nominal small shape (N=16, Cin=8, Cout=32)
    # -> single-grid-step fast path.
    x, ei, w, b = _make_case(k0, num_nodes=16, in_channels=8,
                             out_channels=32, num_edges=40)
    adj = build_normalized_adj(ei, 16)
    ref = conv_block_ref(adj, x, w, b)

    out_f32 = jax.block_until_ready(
        conv_block_pallas(x, ei, w, b, use_bf16=False))
    assert out_f32.shape == (16, 32)
    assert jnp.allclose(out_f32, ref, atol=1e-4, rtol=1e-4)

    out_bf16 = jax.block_until_ready(
        conv_block_pallas(x, ei, w, b, use_bf16=True))
    assert jnp.allclose(out_bf16, ref, atol=5e-2, rtol=5e-2)

    # Case 2: force the tiled path (multi row-tile grid + k-reduction with
    # VMEM-resident XW sliced dynamically inside the kernel).
    x2, ei2, w2, b2 = _make_case(k1, num_nodes=300, in_channels=16,
                                 out_channels=64, num_edges=1200)
    adj2 = build_normalized_adj(ei2, 300)
    ref2 = conv_block_ref(adj2, x2, w2, b2)

    out2 = jax.block_until_ready(
        conv_block_pallas(x2, ei2, w2, b2, tm=128, tn=128, tk=128,
                          use_bf16=False, small_fastpath_bytes=0))
    assert out2.shape == (300, 64)
    assert jnp.allclose(out2, ref2, atol=1e-4, rtol=1e-4)

    out2_bf16 = jax.block_until_ready(
        conv_block_pallas(x2, ei2, w2, b2, tm=128, tn=128, tk=128,
                          use_bf16=True, small_fastpath_bytes=0))
    assert jnp.allclose(out2_bf16, ref2, atol=5e-2, rtol=5e-2)

    # Case 2b: tiled path with per-k XW blocks (non-resident fallback).
    out2_t = jax.block_until_ready(
        conv_block_pallas(x2, ei2, w2, b2, tm=128, tn=128, tk=128,
                          use_bf16=False, small_fastpath_bytes=0,
                          xw_resident_budget=0))
    assert jnp.allclose(out2_t, ref2, atol=1e-4, rtol=1e-4)

    print("KERNEL_OK")
</pallas_src>

<mosaic_0001>
module attributes {stable_mosaic.version = 11 : i64} {
  func.func @kernel(%arg0: i32, %arg1: i32, %arg2: i32, %arg3: memref<16x128xf32, #tpu.memory_space<vmem>>, %arg4: memref<128x128xf32, #tpu.memory_space<vmem>>, %arg5: memref<1x128xf32, #tpu.memory_space<vmem>>, %arg6: memref<16x128xf32, #tpu.memory_space<vmem>>) attributes {dimension_semantics = [#tpu.dimension_semantics<parallel>, #tpu.dimension_semantics<parallel>, #tpu.dimension_semantics<arbitrary>], iteration_bounds = array<i64: 1, 1, 1>, scalar_prefetch = 0 : i64, scratch_operands = 0 : i64, tpu.core_type = #tpu.core_type<tc>, window_params = [{transform_indices = @transform_0, window_bounds = array<i64: 16, 128>}, {transform_indices = @transform_1, window_bounds = array<i64: 128, 128>}, {transform_indices = @transform_2, window_bounds = array<i64: 1, 128>}, {transform_indices = @transform_3, window_bounds = array<i64: 16, 128>}]} {
    %c128_i32 = arith.constant 128 : i32
    %0 = arith.muli %arg2, %c128_i32 : i32
    %1 = tpu.assume_multiple %0, 128 : i32
    %2 = arith.index_cast %1 : i32 to index
    %c0 = arith.constant 0 : index
    %3 = vector.load %arg4[%2, %c0] : memref<128x128xf32, #tpu.memory_space<vmem>>, vector<128x128xf32>
    %c0_0 = arith.constant 0 : index
    %c0_1 = arith.constant 0 : index
    %4 = vector.load %arg3[%c0_0, %c0_1] : memref<16x128xf32, #tpu.memory_space<vmem>>, vector<16x128xf32>
    %cst = arith.constant dense<0.000000e+00> : vector<16x128xf32>
    %5 = tpu.matmul %4, %3, %cst {dimension_numbers = #tpu.dot_dimension_numbers<[1], [0], [0], [1], [0, 0, 1, 1], [], []>} : vector<16x128xf32>, vector<128x128xf32>, vector<16x128xf32> -> vector<16x128xf32>
    %c0_i32 = arith.constant 0 : i32
    %6 = arith.cmpi eq, %arg2, %c0_i32 : i32
    %7 = arith.extui %6 : i1 to i32
    %c0_i32_2 = arith.constant 0 : i32
    %8 = arith.cmpi ne, %7, %c0_i32_2 : i32
    scf.if %8 {
      %c0_7 = arith.constant 0 : index
      %c0_8 = arith.constant 0 : index
      %15 = vector.load %arg6[%c0_7, %c0_8] : memref<16x128xf32, #tpu.memory_space<vmem>>, vector<16x128xf32>
      tpu.vector_store %arg6[%c0_7, %c0_8], %5 {strides = array<i32>} : memref<16x128xf32, #tpu.memory_space<vmem>>, vector<16x128xf32>,
    } else {
    }
    %c0_i32_3 = arith.constant 0 : i32
    %9 = arith.cmpi sgt, %arg2, %c0_i32_3 : i32
    %10 = arith.extui %9 : i1 to i32
    %c0_i32_4 = arith.constant 0 : i32
    %11 = arith.cmpi ne, %10, %c0_i32_4 : i32
    scf.if %11 {
      %c0_7 = arith.constant 0 : index
      %c0_8 = arith.constant 0 : index
      %15 = vector.load %arg6[%c0_7, %c0_8] : memref<16x128xf32, #tpu.memory_space<vmem>>, vector<16x128xf32>
      %16 = arith.addf %15, %5 : vector<16x128xf32>
      %c0_9 = arith.constant 0 : index
      %c0_10 = arith.constant 0 : index
      %17 = vector.load %arg6[%c0_9, %c0_10] : memref<16x128xf32, #tpu.memory_space<vmem>>, vector<16x128xf32>
      tpu.vector_store %arg6[%c0_9, %c0_10], %16 {strides = array<i32>} : memref<16x128xf32, #tpu.memory_space<vmem>>, vector<16x128xf32>,
    } else {
    }
    %c0_i32_5 = arith.constant 0 : i32
    %12 = arith.cmpi eq, %arg2, %c0_i32_5 : i32
    %13 = arith.extui %12 : i1 to i32
    %c0_i32_6 = arith.constant 0 : i32
    %14 = arith.cmpi ne, %13, %c0_i32_6 : i32
    scf.if %14 {
      %c0_7 = arith.constant 0 : index
      %c0_8 = arith.constant 0 : index
      %15 = vector.load %arg6[%c0_7, %c0_8] : memref<16x128xf32, #tpu.memory_space<vmem>>, vector<16x128xf32>
      %c0_9 = arith.constant 0 : index
      %c0_10 = arith.constant 0 : index
      %16 = vector.load %arg5[%c0_9, %c0_10] : memref<1x128xf32, #tpu.memory_space<vmem>>, vector<1x128xf32>
      %17 = vector.broadcast %16 : vector<1x128xf32> to vector<16x128xf32>
      %18 = arith.addf %15, %17 : vector<16x128xf32>
      %cst_11 = arith.constant 0.000000e+00 : f32
      %19 = vector.broadcast %cst_11 : f32 to vector<16x128xf32>
      %20 = arith.cmpf ogt, %18, %19 : vector<16x128xf32>
      %cst_12 = arith.constant 1.000000e-01 : f32
      %21 = vector.broadcast %cst_12 : f32 to vector<16x128xf32>
      %22 = arith.mulf %21, %18 : vector<16x128xf32>
      %23 = arith.select %20, %18, %22 : vector<16x128xi1>, vector<16x128xf32>
      %c0_13 = arith.constant 0 : index
      %c0_14 = arith.constant 0 : index
      %24 = vector.load %arg6[%c0_13, %c0_14] : memref<16x128xf32, #tpu.memory_space<vmem>>, vector<16x128xf32>
      tpu.vector_store %arg6[%c0_13, %c0_14], %23 {strides = array<i32>} : memref<16x128xf32, #tpu.memory_space<vmem>>, vector<16x128xf32>,
    } else {
    }
    return
  }
  func.func @transform_0(%arg0: i32, %arg1: i32, %arg2: i32) -> (i32, i32) {
    %c0_i32 = arith.constant 0 : i32
    return %arg0, %arg2 : i32, i32
  }
  func.func @transform_1(%arg0: i32, %arg1: i32, %arg2: i32) -> (i32, i32) {
    %c0_i32 = arith.constant 0 : i32
    %c0_i32_0 = arith.constant 0 : i32
    return %c0_i32, %arg1 : i32, i32
  }
  func.func @transform_2(%arg0: i32, %arg1: i32, %arg2: i32) -> (i32, i32) {
    %c0_i32 = arith.constant 0 : i32
    %c0_i32_0 = arith.constant 0 : i32
    return %c0_i32, %arg1 : i32, i32
  }
  func.func @transform_3(%arg0: i32, %arg1: i32, %arg2: i32) -> (i32, i32) {
    %c0_i32 = arith.constant 0 : i32
    return %arg0, %arg1 : i32, i32
  }
}

</mosaic_0001>

<bundles_post_ra>
// kernel: tpu_custom_call.1
= control target key start
LH: loop header
LB: loop body
LE: loop exit
PB: predicated region body
PF: predicated region fallthrough
CT: control target
= control target key end

     0   :  { %8 = vsyncpa [#allocation3], 0  ;;  %s430_s0 = inlined_call_operand.hbm [shape: f32[16,128], index: 0, kind: input, shape index: {}]   ;;  %s431_s1 = inlined_call_operand.hbm [shape: f32[128,128], index: 1, kind: input, shape index: {}]   ;;  %s432_s2 = inlined_call_operand.vmem [shape: f32[1,128], index: 2, kind: input, shape index: {}]   ;;  %s433_s3 = inlined_call_operand.hbm [shape: f32[16,128], index: 3, kind: output, shape index: {}]  }
   0x1   :  { %9 = vsyncpa [#allocation6], 0 }
   0x2   :  { %10 = vsyncpa [#allocation4], 0  ;;  %s357_s12 = smov [#allocation2]   ;;  %s285_s16 = scalar_lea.hbm %s430_s0, 256 }
   0x3   :  { %s16_s13 = sshll.u32 %s357_s12, 4  ;;  %p286_p0 = scmp.ne.s32.totalorder %s430_s0, %s285_s16  ;;  %s17_s13 = int_to_ptr.vmem [resolvable:$true] %s16_s13 }
   0x4   :  { %p289_p1 = scmp.lt.u32.totalorder %s285_s16, %s430_s0 }
   0x6   :  { %p291_p2 = pnand %p289_p1, %p286_p0 }
   0x8   :  { %294 = shalt.err (!%p291_p2)
}
   0x9   :  { %s295_s21 = scalar_lea.vmem %s17_s13, 256  ;;  %p300_p4 = scmp.lt.s32.totalorder %s17_s13, %s17_s13 }
   0xa   :  { %p296_p3 = scmp.ne.s32.totalorder %s17_s13, %s295_s21  ;;  %p301_p5 = scmp.lt.s32.totalorder %s295_s21, %s295_s21 }
   0xc   :  { %p302_p6 = por %p301_p5, %p300_p4 }
   0xe   :  { %p303_p7 = pnand %p302_p6, %p296_p3 }
  0x10   :  { %306 = shalt.err (!%p303_p7)
}
  0x11   :  { %s358_s22 = smov 128   ;;  %s359_s23 = smov 8  }
  0x12   :  { %22 = dma.hbm_to_vmem [thread:$0]  %s430_s0, 256, %s17_s13, [#allocation3], %s358_s22, %s358_s22, %s359_s23  }
  0x13   :  { %s360_s26 = smov [#allocation5]   ;;  %s307_s30 = scalar_lea.hbm %s431_s1, 2048 }
  0x14   :  { %s28_s27 = sshll.u32 %s360_s26, 4  ;;  %p308_p8 = scmp.ne.s32.totalorder %s431_s1, %s307_s30  ;;  %s29_s27 = int_to_ptr.vmem [resolvable:$true] %s28_s27 }
  0x15   :  { %p311_p9 = scmp.lt.u32.totalorder %s307_s30, %s431_s1 }
  0x17   :  { %p313_p10 = pnand %p311_p9, %p308_p8 }
  0x19   :  { %316 = shalt.err (!%p313_p10)
}
  0x1a   :  { %s317_s8 = scalar_lea.vmem %s29_s27, 2048  ;;  %p322_p12 = scmp.lt.s32.totalorder %s29_s27, %s29_s27 }
  0x1b   :  { %p318_p11 = scmp.ne.s32.totalorder %s29_s27, %s317_s8  ;;  %p323_p13 = scmp.lt.s32.totalorder %s317_s8, %s317_s8 }
  0x1d   :  { %p324_p0 = por %p323_p13, %p322_p12 }
  0x1f   :  { %p325_p1 = pnand %p324_p0, %p318_p11 }
  0x21   :  { %328 = shalt.err (!%p325_p1)
}
  0x22   :  { %34 = dma.hbm_to_vmem [thread:$0]  %s431_s1, 2048, %s29_s27, [#allocation6], %s358_s22, %s358_s22, %s359_s23  }
  0x23   :  { %351 = dma.done.wait [#allocation3], 256  }
  0x24   :  { %352 = vsyncadd [#allocation3], 4294967040 }
  0x25   :  { %353 = dma.done.wait [#allocation6], 2048  }
  0x26   :  { %354 = vsyncadd [#allocation6], 4294965248  ;;  %v45_v0 = vld [vmem:[#allocation5] sm:$0xff]  ;;  %v46_v1 = vld [vmem:[#allocation5 + $0x8] sm:$0xff]  ;;  %s361_s11 = smov [#allocation7]  }
  0x27   :  { %v47_v2 = vld [vmem:[#allocation5 + $0x10] sm:$0xff]  ;;  %v248_v3 = vpack.c.bf16 %v46_v1, %v45_v0  ;;  %v48_v4 = vld [vmem:[#allocation5 + $0x18] sm:$0xff]  ;;  %v49_v6 = vld [vmem:[#allocation5 + $0x20] sm:$0xff]  ;;  %s181_s12 = sshll.u32 %s361_s11, 4  ;;  %s182_s12 = int_to_ptr.vmem [resolvable:$true] %s181_s12 }
  0x28   :  { %v252_v5 = vpack.c.bf16 %v48_v4, %v47_v2  ;;  %v50_v7 = vld [vmem:[#allocation5 + $0x28] sm:$0xff]  ;;  %v61_v9 = vld [vmem:[#allocation2] sm:$0xff]  ;;  %v52_v11 = vld [vmem:[#allocation5 + $0x38] sm:$0xff]  ;;  %s329_s13 = scalar_lea.vmem %s182_s12, 256  ;;  %p334_p3 = scmp.lt.s32.totalorder %s182_s12, %s182_s12 }
  0x29   :  { %249 = vmatprep.subr.bf16.mxu0 %v248_v3  ;;  %v256_v8 = vpack.c.bf16 %v50_v7, %v49_v6  ;;  %v51_v10 = vld [vmem:[#allocation5 + $0x30] sm:$0xff]  ;;  %245 = vmatprep.mubr.f32.mxu0 %v61_v9  ;;  %v53_v13 = vld [vmem:[#allocation5 + $0x40] sm:$0xff]  ;;  %v54_v14 = vld [vmem:[#allocation5 + $0x48] sm:$0xff]  ;;  %p330_p2 = scmp.ne.s32.totalorder %s182_s12, %s329_s13  ;;  %p335_p4 = scmp.lt.s32.totalorder %s329_s13, %s329_s13 }
  0x2a   :  { %251 = vmatpush3.bf16.msra.mxu0 %v248_v3  ;;  %v260_v12 = vpack.c.bf16 %v52_v11, %v51_v10  ;;  %v264_v15 = vpack.c.bf16 %v54_v14, %v53_v13  ;;  %v55_v16 = vld [vmem:[#allocation5 + $0x50] sm:$0xff]  ;;  %v56_v17 = vld [vmem:[#allocation5 + $0x58] sm:$0xff]  ;;  %v57_v19 = vld [vmem:[#allocation5 + $0x60] sm:$0xff] }
  0x2b   :  { %253 = vmatprep.subr.bf16.mxu0 %v252_v5  ;;  %v268_v18 = vpack.c.bf16 %v56_v17, %v55_v16  ;;  %v58_v20 = vld [vmem:[#allocation5 + $0x68] sm:$0xff]  ;;  %v59_v22 = vld [vmem:[#allocation5 + $0x70] sm:$0xff]  ;;  %v60_v23 = vld [vmem:[#allocation5 + $0x78] sm:$0xff]  ;;  %p336_p5 = por %p335_p4, %p334_p3 }
  0x2c   :  { %v272_v21 = vpack.c.bf16 %v58_v20, %v57_v19  ;;  %v276_v24 = vpack.c.bf16 %v60_v23, %v59_v22  ;;  %v62_v25 = vld [vmem:[#allocation2 + $0x8] sm:$0xff]  ;;  %v194_v26 = vld [vmem:[%s432_s2] ss:$0 sm:$0xff] }
  0x2d   :  { %p337_p6 = pnand %p336_p5, %p330_p2 }
  0x2e   :  { %255 = vmatpush3.bf16.msra.mxu0 %v252_v5 }
  0x2f   :  { %257 = vmatprep.subr.bf16.mxu0 %v256_v8 }
  0x32   :  { %259 = vmatpush3.bf16.msra.mxu0 %v256_v8 }
  0x33   :  { %261 = vmatprep.subr.bf16.mxu0 %v260_v12 }
  0x36   :  { %263 = vmatpush3.bf16.msra.mxu0 %v260_v12 }
  0x37   :  { %265 = vmatprep.subr.bf16.mxu0 %v264_v15 }
  0x3a   :  { %267 = vmatpush3.bf16.msra.mxu0 %v264_v15 }
  0x3b   :  { %269 = vmatprep.subr.bf16.mxu0 %v268_v18 }
  0x3e   :  { %271 = vmatpush3.bf16.msra.mxu0 %v268_v18 }
  0x3f   :  { %273 = vmatprep.subr.bf16.mxu0 %v272_v21 }
  0x42   :  { %275 = vmatpush3.bf16.msra.mxu0 %v272_v21 }
  0x43   :  { %277 = vmatprep.subr.bf16.mxu0 %v276_v24 }
  0x46   :  { %279 = vmatpush3.bf16.msra.mxu0 %v276_v24 }
  0x49   :  { %246 = vmatmul.mubr.f32.vlgmr.msra.gmra.mrb[0].mxu0 %v62_v25 }
 0x11c   :  { %v247_v27 = vpop.f32.mrb[0].mxu0 }
 0x11d   :  { %v129_v28 = vpop.f32.mrb[1].mxu0  ;;  %v167_v29 = vadd.f32 %v247_v27, %v194_v26 }
 0x11e   :  { %v166_v30 = vadd.f32 %v194_v26, %v129_v28 }
 0x11f   :  { %vm169_vm0 = vcmp.gt.f32.partialorder %v167_v29, 0.0  ;;  %v171_v31 = vmul.f32 0.1, %v167_v29 }
 0x120   :  { %vm168_vm1 = vcmp.gt.f32.partialorder %v166_v30, 0.0  ;;  %v170_v32 = vmul.f32 0.1, %v166_v30 }
 0x121   :  { %v173_v33 = vsel %vm169_vm0, %v167_v29, %v171_v31 }
 0x122   :  { %v172_v34 = vsel %vm168_vm1, %v166_v30, %v170_v32  ;;  %175 = vst [vmem:[#allocation7 + $0x8] sm:$0xff] %v173_v33 }
 0x123   :  { %174 = vst [vmem:[#allocation7] sm:$0xff] %v172_v34 }
 0x124   :  { %340 = shalt.err (!%p337_p6)
}
 0x125   :  { %s341_s15 = scalar_lea.hbm %s433_s3, 256 }
 0x126   :  { %p342_p7 = scmp.ne.s32.totalorder %s433_s3, %s341_s15  ;;  %p345_p8 = scmp.lt.u32.totalorder %s341_s15, %s433_s3 }
 0x128   :  { %p347_p9 = pnand %p345_p8, %p342_p7 }
 0x12a   :  { %350 = shalt.err (!%p347_p9)
}
 0x12b   :  { %187 = dma.vmem_to_hbm [thread:$0]  %s182_s12, 256, %s433_s3, [#allocation4], %s358_s22, %s358_s22, %s359_s23  }
 0x12c   :  { %355 = dma.done.wait [#allocation4], 256  }
 0x12d   :  { %356 = vsyncadd [#allocation4], 4294967040 }
 0x12e   :  { %191 = vsyncpa [#allocation3], 1 }
 0x12f   :  { %192 = vsyncpa [#allocation6], 1 }
 0x130   :  { %193 = vsyncpa [#allocation4], 1 }

</bundles_post_ra>
